<compile_context>
chip_gen: v6e
topology: v6e:2x2x1
jax: 0.10.0
libtpu: 0.0.40
codegen_flags: <defaults>
</compile_context>

<pallas_src>
import functools

import jax
import jax.numpy as jnp
from jax.experimental import pallas as pl
from jax.experimental.pallas import tpu as pltpu


def _round_up(x, m):
    return (x + m - 1) // m * m


def _cdiv(a, b):
    return (a + b - 1) // b


def _vmem_capacity_bytes():
    """Per-core VMEM capacity; conservative 64 MiB (v7x) if unqueryable."""
    try:
        info = pltpu.get_tpu_info()
        cap = getattr(info, "vmem_capacity_bytes", None)
        if cap:
            return int(cap)
    except Exception:
        pass
    return 64 << 20


def _mxu_align():
    """256 for the 2x256x256 MXUs (v6e/v7x), 128 for older 128-wide MXUs."""
    try:
        kind = jax.devices()[0].device_kind.lower()
    except Exception:
        return 256
    return 128 if any(v in kind for v in ("v2", "v3", "v4", "v5")) else 256


def _pad_feature(d, align):
    # 256-alignment only when the true dim is big enough that the extra
    # padding waste is small; tiny dims stay lane-dense at 128.
    if align > 128 and d >= 192:
        return _round_up(d, align)
    return _round_up(max(d, 1), 128)


def _largest_tile(d, cap=512):
    for t in (512, 256, 128):
        if t <= cap and d % t == 0:
            return t
    return d  # d is always a multiple of 128 here


# ---------------------------------------------------------------------------
# Kernel 1: fully fused layer stack (weights VMEM-resident, one grid axis: M)
# ---------------------------------------------------------------------------
def _fused_mlp_kernel(*refs, num_layers, alpha):
    """refs = (x_ref, w0, b0, ..., w_{L-1}, b_{L-1}, o_ref).

    One grid step pushes one (block_m, in_pad) bf16 row tile through all
    layers. Matmuls: bf16 operands on the MXU, f32 accumulation. Epilogue
    (bias + LeakyReLU): f32 on the VPU, then a single bf16 cast per layer.
    """
    x_ref = refs[0]
    o_ref = refs[-1]
    wb = refs[1:-1]

    h = x_ref[...]                                   # bf16 (bm, in_pad)
    for l in range(num_layers):                      # static unroll
        w = wb[2 * l][...]                           # bf16 (pi, po)
        b = wb[2 * l + 1][...]                       # f32  (1, po)
        y = jnp.dot(h, w, preferred_element_type=jnp.float32) + b
        if l < num_layers - 1:
            y = jnp.where(y >= 0, y, alpha * y)      # LeakyReLU (f32, VPU)
            h = y.astype(jnp.bfloat16)
        else:
            o_ref[...] = y.astype(o_ref.dtype)


def _build_fused_call(layers, pdims, bm, grid_m, out_pad, out_dtype,
                      num_layers, alpha, vmem_limit, single_buffer_weights):
    in_specs = [pl.BlockSpec((bm, pdims[0]), lambda i: (i, 0))]
    for (w_p, b_p) in layers:
        pi, po = w_p.shape
        if single_buffer_weights:
            # Constant block index -> a second pipeline buffer is pure waste.
            in_specs += [
                pl.BlockSpec((pi, po), lambda i: (0, 0),
                             pipeline_mode=pl.Buffered(1)),
                pl.BlockSpec((1, po), lambda i: (0, 0),
                             pipeline_mode=pl.Buffered(1)),
            ]
        else:
            in_specs += [pl.BlockSpec((pi, po), lambda i: (0, 0)),
                         pl.BlockSpec((1, po), lambda i: (0, 0))]

    kernel = functools.partial(_fused_mlp_kernel, num_layers=num_layers,
                               alpha=alpha)
    B_pad = None  # out_shape rows supplied by caller via closure below
    return pl.pallas_call(
        kernel,
        out_shape=jax.ShapeDtypeStruct((grid_m * 0 + _build_fused_call.B_pad,
                                        out_pad), out_dtype),
        grid_spec=pltpu.PrefetchScalarGridSpec(
            num_scalar_prefetch=0,
            grid=(grid_m,),
            in_specs=in_specs,
            out_specs=pl.BlockSpec((bm, out_pad), lambda i: (i, 0)),
        ),
        compiler_params=pltpu.CompilerParams(
            dimension_semantics=("parallel",),
            vmem_limit_bytes=vmem_limit),
    )


# ---------------------------------------------------------------------------
# Kernel 2: per-layer K/N-tiled matmul (fallback when weights don't fit VMEM)
# ---------------------------------------------------------------------------
def _tiled_linear_kernel(x_ref, w_ref, b_ref, o_ref, acc_ref, *, alpha,
                         apply_act):
    @pl.when(pl.program_id(2) == 0)
    def _():
        acc_ref[...] = jnp.zeros_like(acc_ref)

    acc_ref[...] += jnp.dot(x_ref[...], w_ref[...],
                            preferred_element_type=jnp.float32)

    @pl.when(pl.program_id(2) == pl.num_programs(2) - 1)
    def _():
        y = acc_ref[...] + b_ref[...]
        if apply_act:
            y = jnp.where(y >= 0, y, alpha * y)
        o_ref[...] = y.astype(o_ref.dtype)


def _tiled_linear(x, w_p, b_p, *, alpha, apply_act, out_dtype, bm, vmem_limit):
    M, K = x.shape
    _, N = w_p.shape
    bk = _largest_tile(K)
    bn = _largest_tile(N)
    grid = (pl.cdiv(M, bm), N // bn, K // bk)
    return pl.pallas_call(
        functools.partial(_tiled_linear_kernel, alpha=alpha,
                          apply_act=apply_act),
        out_shape=jax.ShapeDtypeStruct((M, N), out_dtype),
        grid_spec=pltpu.PrefetchScalarGridSpec(
            num_scalar_prefetch=0,
            grid=grid,
            in_specs=[pl.BlockSpec((bm, bk), lambda i, j, k: (i, k)),
                      pl.BlockSpec((bk, bn), lambda i, j, k: (k, j)),
                      pl.BlockSpec((1, bn), lambda i, j, k: (0, j))],
            out_specs=pl.BlockSpec((bm, bn), lambda i, j, k: (i, j)),
            scratch_shapes=[pltpu.VMEM((bm, bn), jnp.float32)]),
        compiler_params=pltpu.CompilerParams(
            dimension_semantics=("parallel", "parallel", "arbitrary"),
            vmem_limit_bytes=vmem_limit),
    )(x, w_p, b_p)


# ---------------------------------------------------------------------------
# Host-side wrappers
# ---------------------------------------------------------------------------
def prepare_mlp_params(params, input_size, align=None):
    """One-time padding + bf16 cast of weights (reused across forward calls)."""
    if align is None:
        align = _mxu_align()
    dims = [input_size] + [w.shape[1] for (w, _) in params]
    pdims = [_pad_feature(d, align) for d in dims]
    layers = []
    for l, (w, b) in enumerate(params):
        di, do = w.shape
        pi, po = pdims[l], pdims[l + 1]
        # bf16 weights: 2x MXU rate + half HBM/VMEM footprint; bias stays f32.
        w_p = jnp.zeros((pi, po), jnp.bfloat16).at[:di, :do].set(
            w.astype(jnp.bfloat16))
        b_p = jnp.zeros((1, po), jnp.float32).at[0, :do].set(b)
        layers.append((w_p, b_p))
    return {"layers": layers, "pdims": pdims,
            "in_features": input_size, "out_features": params[-1][0].shape[1]}


def mlp_forward(x, prepared, alpha, *, max_block_m=256, out_dtype=jnp.float32,
                force_tiled=False):
    """x: (B, input_size) f32. prepared: output of prepare_mlp_params."""
    B, in_f = x.shape
    pdims = prepared["pdims"]
    layers = prepared["layers"]
    num_layers = len(layers)
    out_f = prepared["out_features"]
    out_pad = pdims[-1]

    capacity = _vmem_capacity_bytes()
    vmem_limit = int(0.85 * capacity)

    # Pad batch only to the sublane multiple (8); cast x to bf16 once here.
    # Padded feature columns hit zeroed weight rows, padded rows are sliced off.
    B_pad = _round_up(B, 8)
    x_p = jnp.zeros((B_pad, pdims[0]), jnp.bfloat16).at[:B, :in_f].set(
        x.astype(jnp.bfloat16))

    # Row-tile size: guarantee >= 2 programs when batch allows, so both v7x
    # TensorCores get work; cap at max_block_m to bound VMEM working set.
    if B_pad >= 16:
        bm = min(max_block_m, _round_up(_cdiv(B_pad, 2), 8))
    else:
        bm = B_pad
    grid_m = pl.cdiv(B_pad, bm)

    # VMEM need for the fused path: single-buffered weights + double-buffered
    # I/O tiles + live-activation working set.
    weight_bytes = sum(w.size * w.dtype.itemsize + b.size * b.dtype.itemsize
                       for (w, b) in layers)
    io_bytes = 2 * (bm * pdims[0] * 2 + bm * out_pad * 4)
    act_bytes = 4 * bm * max(pdims) * 4
    need = weight_bytes + io_bytes + act_bytes
    fused_ok = (not force_tiled) and need <= int(0.8 * capacity)

    if fused_ok:
        ops = [x_p]
        for (w_p, b_p) in layers:
            ops += [w_p, b_p]
        _build_fused_call.B_pad = B_pad
        try:
            call = _build_fused_call(layers, pdims, bm, grid_m, out_pad,
                                     out_dtype, num_layers, alpha,
                                     max(vmem_limit, need),
                                     single_buffer_weights=True)
            out = call(*ops)
        except Exception:
            # Older jax without Buffered(1) support: default double-buffering.
            call = _build_fused_call(layers, pdims, bm, grid_m, out_pad,
                                     out_dtype, num_layers, alpha,
                                     max(vmem_limit, 2 * need),
                                     single_buffer_weights=False)
            out = call(*ops)
    else:
        # Per-layer K/N-tiled path for stacks whose resident weights exceed
        # the VMEM budget (e.g. v7x's 64 MiB/TC).
        h = x_p
        for l, (w_p, b_p) in enumerate(layers):
            last = (l == num_layers - 1)
            h = _tiled_linear(h, w_p, b_p, alpha=alpha, apply_act=not last,
                              out_dtype=out_dtype if last else jnp.bfloat16,
                              bm=bm, vmem_limit=vmem_limit)
        out = h

    return out[:B, :out_f]


def init_mlp_params(key, input_size, hidden_size, output_size,
                    num_hidden_layers):
    """PyTorch-Linear-style init: U(-1/sqrt(fan_in), 1/sqrt(fan_in))."""
    sizes = [input_size] + [hidden_size] * num_hidden_layers + [output_size]
    params = []
    for i in range(len(sizes) - 1):
        fan_in, fan_out = sizes[i], sizes[i + 1]
        key, kw, kb = jax.random.split(key, 3)
        bound = 1.0 / jnp.sqrt(fan_in)
        w = jax.random.uniform(kw, (fan_in, fan_out), jnp.float32, -bound, bound)
        b = jax.random.uniform(kb, (fan_out,), jnp.float32, -bound, bound)
        params.append((w, b))
    return params


if __name__ == "__main__":
    batch = 8
    input_size = 32
    hidden_size = 32
    output_size = 16
    num_hidden_layers = 2
    alpha = 0.01

    key = jax.random.PRNGKey(0)
    key, kx = jax.random.split(key)
    x = jax.random.normal(kx, (batch, input_size), jnp.float32)

    params = init_mlp_params(key, input_size, hidden_size, output_size,
                             num_hidden_layers)
    prepared = prepare_mlp_params(params, input_size)

    # Pure-JAX f32 reference (kernel uses bf16 MXU operands, f32 accumulate).
    ref = x
    for (w, b) in params[:-1]:
        ref = ref @ w + b
        ref = jnp.where(ref >= 0, ref, alpha * ref)
    ref = ref @ params[-1][0] + params[-1][1]

    # Fused (weights VMEM-resident) path.
    out = jax.block_until_ready(mlp_forward(x, prepared, alpha))
    assert out.shape == (batch, output_size)
    assert jnp.allclose(out, ref, atol=2e-2, rtol=2e-2), (
        float(jnp.max(jnp.abs(out - ref))))

    # Exercise the K/N-tiled fallback path (used when weights exceed VMEM).
    out_t = jax.block_until_ready(mlp_forward(x, prepared, alpha,
                                              force_tiled=True))
    assert out_t.shape == (batch, output_size)
    assert jnp.allclose(out_t, ref, atol=2e-2, rtol=2e-2), (
        float(jnp.max(jnp.abs(out_t - ref))))

    print("KERNEL_OK")
</pallas_src>

<mosaic_0001>
module attributes {stable_mosaic.version = 11 : i64} {
  func.func @_fused_mlp_kernel(%arg0: i32, %arg1: memref<8x128xbf16, #tpu.memory_space<vmem>>, %arg2: memref<128x128xbf16, #tpu.memory_space<vmem>>, %arg3: memref<1x128xf32, #tpu.memory_space<vmem>>, %arg4: memref<128x128xbf16, #tpu.memory_space<vmem>>, %arg5: memref<1x128xf32, #tpu.memory_space<vmem>>, %arg6: memref<128x128xbf16, #tpu.memory_space<vmem>>, %arg7: memref<1x128xf32, #tpu.memory_space<vmem>>, %arg8: memref<8x128xf32, #tpu.memory_space<vmem>>) attributes {dimension_semantics = [#tpu.dimension_semantics<parallel>], iteration_bounds = array<i64: 1>, scalar_prefetch = 0 : i64, scratch_operands = 0 : i64, tpu.core_type = #tpu.core_type<tc>, window_params = [{transform_indices = @transform_0, window_bounds = array<i64: 8, 128>}, {pipeline_mode = #tpu.pipeline_mode<synchronous>, transform_indices = @transform_1, window_bounds = array<i64: 128, 128>}, {pipeline_mode = #tpu.pipeline_mode<synchronous>, transform_indices = @transform_2, window_bounds = array<i64: 1, 128>}, {pipeline_mode = #tpu.pipeline_mode<synchronous>, transform_indices = @transform_3, window_bounds = array<i64: 128, 128>}, {pipeline_mode = #tpu.pipeline_mode<synchronous>, transform_indices = @transform_4, window_bounds = array<i64: 1, 128>}, {pipeline_mode = #tpu.pipeline_mode<synchronous>, transform_indices = @transform_5, window_bounds = array<i64: 128, 128>}, {pipeline_mode = #tpu.pipeline_mode<synchronous>, transform_indices = @transform_6, window_bounds = array<i64: 1, 128>}, {transform_indices = @transform_7, window_bounds = array<i64: 8, 128>}]} {
    %c0 = arith.constant 0 : index
    %c0_0 = arith.constant 0 : index
    %0 = vector.load %arg1[%c0, %c0_0] : memref<8x128xbf16, #tpu.memory_space<vmem>>, vector<8x128xbf16>
    %c0_1 = arith.constant 0 : index
    %c0_2 = arith.constant 0 : index
    %1 = vector.load %arg2[%c0_1, %c0_2] : memref<128x128xbf16, #tpu.memory_space<vmem>>, vector<128x128xbf16>
    %c0_3 = arith.constant 0 : index
    %c0_4 = arith.constant 0 : index
    %2 = vector.load %arg3[%c0_3, %c0_4] : memref<1x128xf32, #tpu.memory_space<vmem>>, vector<1x128xf32>
    %cst = arith.constant dense<0.000000e+00> : vector<8x128xf32>
    %3 = tpu.matmul %0, %1, %cst {dimension_numbers = #tpu.dot_dimension_numbers<[1], [0], [0], [1], [0, 0, 1, 1], [], []>} : vector<8x128xbf16>, vector<128x128xbf16>, vector<8x128xf32> -> vector<8x128xf32>
    %4 = vector.broadcast %2 : vector<1x128xf32> to vector<8x128xf32>
    %5 = arith.addf %3, %4 : vector<8x128xf32>
    %cst_5 = arith.constant 0.000000e+00 : f32
    %6 = vector.broadcast %cst_5 : f32 to vector<8x128xf32>
    %7 = arith.cmpf oge, %5, %6 : vector<8x128xf32>
    %cst_6 = arith.constant 0.00999999977 : f32
    %8 = vector.broadcast %cst_6 : f32 to vector<8x128xf32>
    %9 = arith.mulf %8, %5 : vector<8x128xf32>
    %10 = arith.select %7, %5, %9 : vector<8x128xi1>, vector<8x128xf32>
    %11 = arith.truncf %10 : vector<8x128xf32> to vector<8x128xbf16>
    %c0_7 = arith.constant 0 : index
    %c0_8 = arith.constant 0 : index
    %12 = vector.load %arg4[%c0_7, %c0_8] : memref<128x128xbf16, #tpu.memory_space<vmem>>, vector<128x128xbf16>
    %c0_9 = arith.constant 0 : index
    %c0_10 = arith.constant 0 : index
    %13 = vector.load %arg5[%c0_9, %c0_10] : memref<1x128xf32, #tpu.memory_space<vmem>>, vector<1x128xf32>
    %cst_11 = arith.constant dense<0.000000e+00> : vector<8x128xf32>
    %14 = tpu.matmul %11, %12, %cst_11 {dimension_numbers = #tpu.dot_dimension_numbers<[1], [0], [0], [1], [0, 0, 1, 1], [], []>} : vector<8x128xbf16>, vector<128x128xbf16>, vector<8x128xf32> -> vector<8x128xf32>
    %15 = vector.broadcast %13 : vector<1x128xf32> to vector<8x128xf32>
    %16 = arith.addf %14, %15 : vector<8x128xf32>
    %cst_12 = arith.constant 0.000000e+00 : f32
    %17 = vector.broadcast %cst_12 : f32 to vector<8x128xf32>
    %18 = arith.cmpf oge, %16, %17 : vector<8x128xf32>
    %cst_13 = arith.constant 0.00999999977 : f32
    %19 = vector.broadcast %cst_13 : f32 to vector<8x128xf32>
    %20 = arith.mulf %19, %16 : vector<8x128xf32>
    %21 = arith.select %18, %16, %20 : vector<8x128xi1>, vector<8x128xf32>
    %22 = arith.truncf %21 : vector<8x128xf32> to vector<8x128xbf16>
    %c0_14 = arith.constant 0 : index
    %c0_15 = arith.constant 0 : index
    %23 = vector.load %arg6[%c0_14, %c0_15] : memref<128x128xbf16, #tpu.memory_space<vmem>>, vector<128x128xbf16>
    %c0_16 = arith.constant 0 : index
    %c0_17 = arith.constant 0 : index
    %24 = vector.load %arg7[%c0_16, %c0_17] : memref<1x128xf32, #tpu.memory_space<vmem>>, vector<1x128xf32>
    %cst_18 = arith.constant dense<0.000000e+00> : vector<8x128xf32>
    %25 = tpu.matmul %22, %23, %cst_18 {dimension_numbers = #tpu.dot_dimension_numbers<[1], [0], [0], [1], [0, 0, 1, 1], [], []>} : vector<8x128xbf16>, vector<128x128xbf16>, vector<8x128xf32> -> vector<8x128xf32>
    %26 = vector.broadcast %24 : vector<1x128xf32> to vector<8x128xf32>
    %27 = arith.addf %25, %26 : vector<8x128xf32>
    %c0_19 = arith.constant 0 : index
    %c0_20 = arith.constant 0 : index
    %28 = vector.load %arg8[%c0_19, %c0_20] : memref<8x128xf32, #tpu.memory_space<vmem>>, vector<8x128xf32>
    tpu.vector_store %arg8[%c0_19, %c0_20], %27 {strides = array<i32>} : memref<8x128xf32, #tpu.memory_space<vmem>>, vector<8x128xf32>,
    return
  }
  func.func @transform_0(%arg0: i32) -> (i32, i32) {
    %c0_i32 = arith.constant 0 : i32
    %c0_i32_0 = arith.constant 0 : i32
    return %arg0, %c0_i32 : i32, i32
  }
  func.func @transform_1(%arg0: i32) -> (i32, i32) {
    %c0_i32 = arith.constant 0 : i32
    %c0_i32_0 = arith.constant 0 : i32
    %c0_i32_1 = arith.constant 0 : i32
    return %c0_i32, %c0_i32_0 : i32, i32
  }
  func.func @transform_2(%arg0: i32) -> (i32, i32) {
    %c0_i32 = arith.constant 0 : i32
    %c0_i32_0 = arith.constant 0 : i32
    %c0_i32_1 = arith.constant 0 : i32
    return %c0_i32, %c0_i32_0 : i32, i32
  }
  func.func @transform_3(%arg0: i32) -> (i32, i32) {
    %c0_i32 = arith.constant 0 : i32
    %c0_i32_0 = arith.constant 0 : i32
    %c0_i32_1 = arith.constant 0 : i32
    return %c0_i32, %c0_i32_0 : i32, i32
  }
  func.func @transform_4(%arg0: i32) -> (i32, i32) {
    %c0_i32 = arith.constant 0 : i32
    %c0_i32_0 = arith.constant 0 : i32
    %c0_i32_1 = arith.constant 0 : i32
    return %c0_i32, %c0_i32_0 : i32, i32
  }
  func.func @transform_5(%arg0: i32) -> (i32, i32) {
    %c0_i32 = arith.constant 0 : i32
    %c0_i32_0 = arith.constant 0 : i32
    %c0_i32_1 = arith.constant 0 : i32
    return %c0_i32, %c0_i32_0 : i32, i32
  }
  func.func @transform_6(%arg0: i32) -> (i32, i32) {
    %c0_i32 = arith.constant 0 : i32
    %c0_i32_0 = arith.constant 0 : i32
    %c0_i32_1 = arith.constant 0 : i32
    return %c0_i32, %c0_i32_0 : i32, i32
  }
  func.func @transform_7(%arg0: i32) -> (i32, i32) {
    %c0_i32 = arith.constant 0 : i32
    %c0_i32_0 = arith.constant 0 : i32
    return %arg0, %c0_i32 : i32, i32
  }
}

module attributes {stable_mosaic.version = 11 : i64} {
  func.func @_fused_mlp_kernel(%arg0: i32, %arg1: memref<8x128xbf16, #tpu.memory_space<vmem>>, %arg2: memref<128x128xbf16, #tpu.memory_space<vmem>>, %arg3: memref<1x128xf32, #tpu.memory_space<vmem>>, %arg4: memref<128x128xbf16, #tpu.memory_space<vmem>>, %arg5: memref<1x128xf32, #tpu.memory_space<vmem>>, %arg6: memref<128x128xbf16, #tpu.memory_space<vmem>>, %arg7: memref<1x128xf32, #tpu.memory_space<vmem>>, %arg8: memref<8x128xf32, #tpu.memory_space<vmem>>) attributes {dimension_semantics = [#tpu.dimension_semantics<parallel>], iteration_bounds = array<i64: 1>, scalar_prefetch = 0 : i64, scratch_operands = 0 : i64, tpu.core_type = #tpu.core_type<tc>, window_params = [{transform_indices = @transform_0, window_bounds = array<i64: 8, 128>}, {pipeline_mode = #tpu.pipeline_mode<synchronous>, transform_indices = @transform_1, window_bounds = array<i64: 128, 128>}, {pipeline_mode = #tpu.pipeline_mode<synchronous>, transform_indices = @transform_2, window_bounds = array<i64: 1, 128>}, {pipeline_mode = #tpu.pipeline_mode<synchronous>, transform_indices = @transform_3, window_bounds = array<i64: 128, 128>}, {pipeline_mode = #tpu.pipeline_mode<synchronous>, transform_indices = @transform_4, window_bounds = array<i64: 1, 128>}, {pipeline_mode = #tpu.pipeline_mode<synchronous>, transform_indices = @transform_5, window_bounds = array<i64: 128, 128>}, {pipeline_mode = #tpu.pipeline_mode<synchronous>, transform_indices = @transform_6, window_bounds = array<i64: 1, 128>}, {transform_indices = @transform_7, window_bounds = array<i64: 8, 128>}]} {
    %c0 = arith.constant 0 : index
    %c0_0 = arith.constant 0 : index
    %0 = vector.load %arg1[%c0, %c0_0] : memref<8x128xbf16, #tpu.memory_space<vmem>>, vector<8x128xbf16>
    %c0_1 = arith.constant 0 : index
    %c0_2 = arith.constant 0 : index
    %1 = vector.load %arg2[%c0_1, %c0_2] : memref<128x128xbf16, #tpu.memory_space<vmem>>, vector<128x128xbf16>
    %c0_3 = arith.constant 0 : index
    %c0_4 = arith.constant 0 : index
    %2 = vector.load %arg3[%c0_3, %c0_4] : memref<1x128xf32, #tpu.memory_space<vmem>>, vector<1x128xf32>
    %cst = arith.constant dense<0.000000e+00> : vector<8x128xf32>
    %3 = tpu.matmul %0, %1, %cst {dimension_numbers = #tpu.dot_dimension_numbers<[1], [0], [0], [1], [0, 0, 1, 1], [], []>} : vector<8x128xbf16>, vector<128x128xbf16>, vector<8x128xf32> -> vector<8x128xf32>
    %4 = vector.broadcast %2 : vector<1x128xf32> to vector<8x128xf32>
    %5 = arith.addf %3, %4 : vector<8x128xf32>
    %cst_5 = arith.constant 0.000000e+00 : f32
    %6 = vector.broadcast %cst_5 : f32 to vector<8x128xf32>
    %7 = arith.cmpf oge, %5, %6 : vector<8x128xf32>
    %cst_6 = arith.constant 0.00999999977 : f32
    %8 = vector.broadcast %cst_6 : f32 to vector<8x128xf32>
    %9 = arith.mulf %8, %5 : vector<8x128xf32>
    %10 = arith.select %7, %5, %9 : vector<8x128xi1>, vector<8x128xf32>
    %11 = arith.truncf %10 : vector<8x128xf32> to vector<8x128xbf16>
    %c0_7 = arith.constant 0 : index
    %c0_8 = arith.constant 0 : index
    %12 = vector.load %arg4[%c0_7, %c0_8] : memref<128x128xbf16, #tpu.memory_space<vmem>>, vector<128x128xbf16>
    %c0_9 = arith.constant 0 : index
    %c0_10 = arith.constant 0 : index
    %13 = vector.load %arg5[%c0_9, %c0_10] : memref<1x128xf32, #tpu.memory_space<vmem>>, vector<1x128xf32>
    %cst_11 = arith.constant dense<0.000000e+00> : vector<8x128xf32>
    %14 = tpu.matmul %11, %12, %cst_11 {dimension_numbers = #tpu.dot_dimension_numbers<[1], [0], [0], [1], [0, 0, 1, 1], [], []>} : vector<8x128xbf16>, vector<128x128xbf16>, vector<8x128xf32> -> vector<8x128xf32>
    %15 = vector.broadcast %13 : vector<1x128xf32> to vector<8x128xf32>
    %16 = arith.addf %14, %15 : vector<8x128xf32>
    %cst_12 = arith.constant 0.000000e+00 : f32
    %17 = vector.broadcast %cst_12 : f32 to vector<8x128xf32>
    %18 = arith.cmpf oge, %16, %17 : vector<8x128xf32>
    %cst_13 = arith.constant 0.00999999977 : f32
    %19 = vector.broadcast %cst_13 : f32 to vector<8x128xf32>
    %20 = arith.mulf %19, %16 : vector<8x128xf32>
    %21 = arith.select %18, %16, %20 : vector<8x128xi1>, vector<8x128xf32>
    %22 = arith.truncf %21 : vector<8x128xf32> to vector<8x128xbf16>
    %c0_14 = arith.constant 0 : index
    %c0_15 = arith.constant 0 : index
    %23 = vector.load %arg6[%c0_14, %c0_15] : memref<128x128xbf16, #tpu.memory_space<vmem>>, vector<128x128xbf16>
    %c0_16 = arith.constant 0 : index
    %c0_17 = arith.constant 0 : index
    %24 = vector.load %arg7[%c0_16, %c0_17] : memref<1x128xf32, #tpu.memory_space<vmem>>, vector<1x128xf32>
    %cst_18 = arith.constant dense<0.000000e+00> : vector<8x128xf32>
    %25 = tpu.matmul %22, %23, %cst_18 {dimension_numbers = #tpu.dot_dimension_numbers<[1], [0], [0], [1], [0, 0, 1, 1], [], []>} : vector<8x128xbf16>, vector<128x128xbf16>, vector<8x128xf32> -> vector<8x128xf32>
    %26 = vector.broadcast %24 : vector<1x128xf32> to vector<8x128xf32>
    %27 = arith.addf %25, %26 : vector<8x128xf32>
    %c0_19 = arith.constant 0 : index
    %c0_20 = arith.constant 0 : index
    %28 = vector.load %arg8[%c0_19, %c0_20] : memref<8x128xf32, #tpu.memory_space<vmem>>, vector<8x128xf32>
    tpu.vector_store %arg8[%c0_19, %c0_20], %27 {strides = array<i32>} : memref<8x128xf32, #tpu.memory_space<vmem>>, vector<8x128xf32>,
    return
  }
  func.func @transform_0(%arg0: i32) -> (i32, i32) {
    %c0_i32 = arith.constant 0 : i32
    %c0_i32_0 = arith.constant 0 : i32
    return %arg0, %c0_i32 : i32, i32
  }
  func.func @transform_1(%arg0: i32) -> (i32, i32) {
    %c0_i32 = arith.constant 0 : i32
    %c0_i32_0 = arith.constant 0 : i32
    %c0_i32_1 = arith.constant 0 : i32
    return %c0_i32, %c0_i32_0 : i32, i32
  }
  func.func @transform_2(%arg0: i32) -> (i32, i32) {
    %c0_i32 = arith.constant 0 : i32
    %c0_i32_0 = arith.constant 0 : i32
    %c0_i32_1 = arith.constant 0 : i32
    return %c0_i32, %c0_i32_0 : i32, i32
  }
  func.func @transform_3(%arg0: i32) -> (i32, i32) {
    %c0_i32 = arith.constant 0 : i32
    %c0_i32_0 = arith.constant 0 : i32
    %c0_i32_1 = arith.constant 0 : i32
    return %c0_i32, %c0_i32_0 : i32, i32
  }
  func.func @transform_4(%arg0: i32) -> (i32, i32) {
    %c0_i32 = arith.constant 0 : i32
    %c0_i32_0 = arith.constant 0 : i32
    %c0_i32_1 = arith.constant 0 : i32
    return %c0_i32, %c0_i32_0 : i32, i32
  }
  func.func @transform_5(%arg0: i32) -> (i32, i32) {
    %c0_i32 = arith.constant 0 : i32
    %c0_i32_0 = arith.constant 0 : i32
    %c0_i32_1 = arith.constant 0 : i32
    return %c0_i32, %c0_i32_0 : i32, i32
  }
  func.func @transform_6(%arg0: i32) -> (i32, i32) {
    %c0_i32 = arith.constant 0 : i32
    %c0_i32_0 = arith.constant 0 : i32
    %c0_i32_1 = arith.constant 0 : i32
    return %c0_i32, %c0_i32_0 : i32, i32
  }
  func.func @transform_7(%arg0: i32) -> (i32, i32) {
    %c0_i32 = arith.constant 0 : i32
    %c0_i32_0 = arith.constant 0 : i32
    return %arg0, %c0_i32 : i32, i32
  }
}

</mosaic_0001>

<bundles_post_ra>
// kernel: tpu_custom_call.1
= control target key start
LH: loop header
LB: loop body
LE: loop exit
PB: predicated region body
PF: predicated region fallthrough
CT: control target
= control target key end

     0   :  { %12 = vsyncpa [#allocation3], 0  ;;  %s808_s0 = inlined_call_operand.hbm [shape: bf16[8,128], index: 0, kind: input, shape index: {}]   ;;  %s809_s1 = inlined_call_operand.hbm [shape: bf16[128,128], index: 1, kind: input, shape index: {}]   ;;  %s810_s2 = inlined_call_operand.vmem [shape: f32[1,128], index: 2, kind: input, shape index: {}]   ;;  %s811_s3 = inlined_call_operand.hbm [shape: bf16[128,128], index: 3, kind: input, shape index: {}]   ;;  %s812_s4 = inlined_call_operand.vmem [shape: f32[1,128], index: 4, kind: input, shape index: {}]   ;;  %s813_s5 = inlined_call_operand.hbm [shape: bf16[128,128], index: 5, kind: input, shape index: {}]   ;;  %s814_s6 = inlined_call_operand.vmem [shape: f32[1,128], index: 6, kind: input, shape index: {}]   ;;  %s815_s7 = inlined_call_operand.hbm [shape: f32[8,128], index: 7, kind: output, shape index: {}]  }
   0x1   :  { %13 = vsyncpa [#allocation6], 0 }
   0x2   :  { %14 = vsyncpa [#allocation9], 0 }
   0x3   :  { %15 = vsyncpa [#allocation4], 0  ;;  %s696_s24 = smov [#allocation5]  }
   0x4   :  { %s31_s25 = sshll.u32 %s696_s24, 4  ;;  %s32_s25 = int_to_ptr.vmem [resolvable:$true] %s31_s25 }
   0x5   :  { %s596_s26 = scalar_lea.vmem %s32_s25, 1024  ;;  %p601_p1 = scmp.lt.s32.totalorder %s32_s25, %s32_s25 }
   0x6   :  { %p597_p0 = scmp.ne.s32.totalorder %s32_s25, %s596_s26  ;;  %p602_p2 = scmp.lt.s32.totalorder %s596_s26, %s596_s26 }
   0x8   :  { %p603_p3 = por %p602_p2, %p601_p1 }
   0xa   :  { %p604_p4 = pnand %p603_p3, %p597_p0 }
   0xc   :  { %607 = shalt.err (!%p604_p4)
}
   0xd   :  { %s697_s27 = smov 64   ;;  %s698_s28 = smov 4  }
   0xe   :  { %37 = dma.hbm_to_vmem [thread:$0]  %s809_s1, 1024, %s32_s25, [#allocation6], %s697_s27, %s697_s27, %s698_s28  }
   0xf   :  { %s699_s8 = smov [#allocation2]   ;;  %s700_s10 = smov [#allocation7]  }
  0x10   :  { %s22_s9 = sshll.u32 %s699_s8, 4  ;;  %s45_s11 = sshll.u32 %s700_s10, 4  ;;  %s23_s9 = int_to_ptr.vmem [resolvable:$true] %s22_s9  ;;  %s46_s11 = int_to_ptr.vmem [resolvable:$true] %s45_s11 }
  0x11   :  { %s616_s12 = scalar_lea.vmem %s23_s9, 64  ;;  %p621_p6 = scmp.lt.s32.totalorder %s23_s9, %s23_s9 }
  0x12   :  { %p617_p5 = scmp.ne.s32.totalorder %s23_s9, %s616_s12  ;;  %p622_p7 = scmp.lt.s32.totalorder %s616_s12, %s616_s12 }
  0x14   :  { %p623_p8 = por %p622_p7, %p621_p6 }
  0x16   :  { %p624_p9 = pnand %p623_p8, %p617_p5 }
  0x18   :  { %627 = shalt.err (!%p624_p9)
}
  0x19   :  { %25 = dma.hbm_to_vmem [thread:$0]  %s808_s0, 64, %s23_s9, [#allocation3]  }
  0x1a   :  { %s636_s15 = scalar_lea.vmem %s46_s11, 1024  ;;  %p641_p11 = scmp.lt.s32.totalorder %s46_s11, %s46_s11 }
  0x1b   :  { %p637_p10 = scmp.ne.s32.totalorder %s46_s11, %s636_s15  ;;  %p642_p12 = scmp.lt.s32.totalorder %s636_s15, %s636_s15 }
  0x1d   :  { %p643_p13 = por %p642_p12, %p641_p11 }
  0x1f   :  { %p644_p0 = pnand %p643_p13, %p637_p10 }
  0x21   :  { %647 = shalt.err (!%p644_p0)
}
  0x22   :  { %51 = dma.hbm_to_vmem [thread:$0]  %s811_s3, 1024, %s46_s11, [#allocation6], %s697_s27, %s697_s27, %s698_s28  }
  0x23   :  { %s701_s17 = smov [#allocation8]  }
  0x24   :  { %s59_s18 = sshll.u32 %s701_s17, 4  ;;  %s60_s18 = int_to_ptr.vmem [resolvable:$true] %s59_s18 }
  0x25   :  { %s656_s19 = scalar_lea.vmem %s60_s18, 1024  ;;  %p661_p2 = scmp.lt.s32.totalorder %s60_s18, %s60_s18 }
  0x26   :  { %p657_p1 = scmp.ne.s32.totalorder %s60_s18, %s656_s19  ;;  %p662_p3 = scmp.lt.s32.totalorder %s656_s19, %s656_s19 }
  0x28   :  { %p663_p4 = por %p662_p3, %p661_p2 }
  0x2a   :  { %p664_p5 = pnand %p663_p4, %p657_p1 }
  0x2c   :  { %667 = shalt.err (!%p664_p5)
}
  0x2d   :  { %65 = dma.hbm_to_vmem [thread:$0]  %s813_s5, 1024, %s60_s18, [#allocation9], %s697_s27, %s697_s27, %s698_s28  }
  0x2e   :  { %688 = dma.done.wait [#allocation3], 64  }
  0x2f   :  { %689 = vsyncadd [#allocation3], 4294967232 }
  0x30   :  { %690 = dma.done.wait [#allocation6], 2048  }
  0x31   :  { %691 = vsyncadd [#allocation6], 4294965248 }
  0x32   :  { %692 = dma.done.wait [#allocation9], 1024  }
  0x33   :  { %693 = vsyncadd [#allocation9], 4294966272  ;;  %v702_v0 = vmov 0.0   ;;  %vm703_vm0 = vmmov 0   ;;  %v564_v1 = vld [vmem:[#allocation5 + $0x38] sm:$0xff]   ;;  %v565_v2 = vld [vmem:[#allocation5 + $0x30] sm:$0xff]  }
  0x34   :  { %495 = vmatprep.subr.bf16.mxu0 %v702_v0  ;;  %511 = vmatprep.mubr.msk.bf16.mxu0 %vm703_vm0, %v702_v0  ;;  %v566_v3 = vld [vmem:[#allocation5 + $0x28] sm:$0xff]   ;;  %v572_v4 = vld [vmem:[#allocation7 + $0x38] sm:$0xff]   ;;  %v567_v5 = vld [vmem:[#allocation5 + $0x20] sm:$0xff]   ;;  %s704_s24 = smov [#allocation10]  }
  0x35   :  { %515 = vmatprep.subr.bf16.mxu1 %v702_v0  ;;  %531 = vmatprep.mubr.msk.bf16.mxu1 %vm703_vm0, %v702_v0  ;;  %v573_v6 = vld [vmem:[#allocation7 + $0x30] sm:$0xff]   ;;  %v568_v7 = vld [vmem:[#allocation5 + $0x18] sm:$0xff]   ;;  %v574_v8 = vld [vmem:[#allocation7 + $0x28] sm:$0xff]   ;;  %s430_s25 = sshll.u32 %s704_s24, 4  ;;  %s431_s25 = int_to_ptr.vmem [resolvable:$true] %s430_s25 }
  0x36   :  { %496 = vmatpush3.bf16.msra.mxu0 %v564_v1  ;;  %516 = vmatpush3.bf16.msra.mxu1 %v572_v4  ;;  %v569_v9 = vld [vmem:[#allocation5 + $0x10] sm:$0xff]   ;;  %v575_v10 = vld [vmem:[#allocation7 + $0x20] sm:$0xff]   ;;  %v570_v11 = vld [vmem:[#allocation5 + $0x8] sm:$0xff]   ;;  %p673_p7 = scmp.lt.s32.totalorder %s431_s25, %s431_s25 }
  0x37   :  { %497 = vmatprep.subr.bf16.mxu0 %v702_v0  ;;  %517 = vmatprep.subr.bf16.mxu1 %v702_v0  ;;  %v576_v12 = vld [vmem:[#allocation7 + $0x18] sm:$0xff]   ;;  %v571_v13 = vld [vmem:[#allocation5] sm:$0xff]   ;;  %v577_v14 = vld [vmem:[#allocation7 + $0x10] sm:$0xff]  }
  0x38   :  { %v81_v15 = vld [vmem:[#allocation2] sm:$0xf]  ;;  %v578_v16 = vld [vmem:[#allocation7 + $0x8] sm:$0xff]   ;;  %v579_v17 = vld [vmem:[#allocation7] sm:$0xff]  }
  0x39   :  { %v580_v18 = vld [vmem:[#allocation8 + $0x38] sm:$0xff]   ;;  %v581_v19 = vld [vmem:[#allocation8 + $0x30] sm:$0xff]   ;;  %v582_v20 = vld [vmem:[#allocation8 + $0x28] sm:$0xff]  }
  0x3a   :  { %498 = vmatpush3.bf16.msra.mxu0 %v565_v2  ;;  %518 = vmatpush3.bf16.msra.mxu1 %v573_v6  ;;  %v583_v21 = vld [vmem:[#allocation8 + $0x20] sm:$0xff]   ;;  %v584_v22 = vld [vmem:[#allocation8 + $0x18] sm:$0xff]   ;;  %v585_v23 = vld [vmem:[#allocation8 + $0x10] sm:$0xff]  }
  0x3b   :  { %499 = vmatprep.subr.bf16.mxu0 %v702_v0  ;;  %519 = vmatprep.subr.bf16.mxu1 %v702_v0  ;;  %v441_v24 = vld [vmem:[%s810_s2] ss:$0 sm:$0xff]  ;;  %v586_v33 = vld [vmem:[#allocation8 + $0x8] sm:$0xff]   ;;  %v587_v34 = vld [vmem:[#allocation8] sm:$0xff]  }
  0x3c   :  { %v450_v35 = vld [vmem:[%s812_s4] ss:$0 sm:$0xff]  ;;  %s668_s4 = scalar_lea.vmem %s431_s25, 128 }
  0x3d   :  { %v459_v44 = vld [vmem:[%s814_s6] ss:$0 sm:$0xff]  ;;  %p669_p6 = scmp.ne.s32.totalorder %s431_s25, %s668_s4  ;;  %p674_p8 = scmp.lt.s32.totalorder %s668_s4, %s668_s4 }
  0x3e   :  { %500 = vmatpush3.bf16.msra.mxu0 %v566_v3  ;;  %520 = vmatpush3.bf16.msra.mxu1 %v574_v8 }
  0x3f   :  { %501 = vmatprep.subr.bf16.mxu0 %v702_v0  ;;  %521 = vmatprep.subr.bf16.mxu1 %v702_v0  ;;  %p675_p9 = por %p674_p8, %p673_p7 }
  0x41   :  { %p676_p10 = pnand %p675_p9, %p669_p6 }
  0x42   :  { %502 = vmatpush3.bf16.msra.mxu0 %v567_v5  ;;  %522 = vmatpush3.bf16.msra.mxu1 %v575_v10 }
  0x43   :  { %503 = vmatprep.subr.bf16.mxu0 %v702_v0  ;;  %523 = vmatprep.subr.bf16.mxu1 %v702_v0 }
  0x46   :  { %504 = vmatpush3.bf16.msra.mxu0 %v568_v7  ;;  %524 = vmatpush3.bf16.msra.mxu1 %v576_v12 }
  0x47   :  { %505 = vmatprep.subr.bf16.mxu0 %v702_v0  ;;  %525 = vmatprep.subr.bf16.mxu1 %v702_v0 }
  0x4a   :  { %506 = vmatpush3.bf16.msra.mxu0 %v569_v9  ;;  %526 = vmatpush3.bf16.msra.mxu1 %v577_v14 }
  0x4b   :  { %507 = vmatprep.subr.bf16.mxu0 %v702_v0  ;;  %527 = vmatprep.subr.bf16.mxu1 %v702_v0 }
  0x4e   :  { %508 = vmatpush3.bf16.msra.mxu0 %v570_v11  ;;  %528 = vmatpush3.bf16.msra.mxu1 %v578_v16 }
  0x4f   :  { %509 = vmatprep.subr.bf16.mxu0 %v702_v0  ;;  %529 = vmatprep.subr.bf16.mxu1 %v702_v0 }
  0x52   :  { %510 = vmatpush3.bf16.msra.mxu0 %v571_v13  ;;  %530 = vmatpush3.bf16.msra.mxu1 %v579_v17 }
  0x53   :  { %535 = vmatprep.subr.bf16.mxu0 %v702_v0 }
  0x55   :  { %512 = vmatmul.mubr.bf16.vlgmr.msra.gmra.mxu0 %v81_v15 }
  0x56   :  { %551 = vmatprep.mubr.msk.bf16.mxu0 %vm703_vm0, %v702_v0  ;;  %536 = vmatpush3.bf16.msra.mxu0 %v580_v18 }
  0x57   :  { %537 = vmatprep.subr.bf16.mxu0 %v702_v0 }
  0x5a   :  { %538 = vmatpush3.bf16.msra.mxu0 %v581_v19 }
  0x5b   :  { %539 = vmatprep.subr.bf16.mxu0 %v702_v0 }
  0x5e   :  { %540 = vmatpush3.bf16.msra.mxu0 %v582_v20 }
  0x5f   :  { %541 = vmatprep.subr.bf16.mxu0 %v702_v0 }
  0x62   :  { %542 = vmatpush3.bf16.msra.mxu0 %v583_v21 }
  0x63   :  { %543 = vmatprep.subr.bf16.mxu0 %v702_v0 }
  0x66   :  { %544 = vmatpush3.bf16.msra.mxu0 %v584_v22 }
  0x67   :  { %545 = vmatprep.subr.bf16.mxu0 %v702_v0 }
  0x6a   :  { %546 = vmatpush3.bf16.msra.mxu0 %v585_v23 }
  0x6b   :  { %547 = vmatprep.subr.bf16.mxu0 %v702_v0 }
  0x6e   :  { %548 = vmatpush3.bf16.msra.mxu0 %v586_v33 }
  0x6f   :  { %549 = vmatprep.subr.bf16.mxu0 %v702_v0 }
  0x72   :  { %550 = vmatpush3.bf16.msra.mxu0 %v587_v34 }
 0x115   :  { %v187_v25 = vpop.f32.mrf.mxu0 }
 0x116   :  { %v188_v26 = vadd.f32 %v441_v24, %v187_v25 }
 0x117   :  { %v513_v27 = vpop.f32.mrf.mxu0 }
 0x118   :  { %vm193_vm1 = vcmp.ge.f32.partialorder %v188_v26, 0.0  ;;  %v194_v28 = vmul.f32 0.01, %v188_v26 }
 0x119   :  { %v190_v29 = vpop.f32.mrf.mxu0 }
 0x11a   :  { %v195_v30 = vsel %vm193_vm1, %v188_v26, %v194_v28 }
 0x11b   :  { %v514_v31 = vpop.f32.mrf.mxu0  ;;  %v196_v32 = vpack.c.bf16 %v195_v30, %v195_v30 }
 0x11d   :  { %532 = vmatmul.mubr.bf16.vlgmr.msra.gmra.mxu1 %v196_v32 }
 0x1dd   :  { %v302_v36 = vpop.f32.mrf.mxu1 }
 0x1de   :  { %v303_v37 = vadd.f32 %v450_v35, %v302_v36 }
 0x1df   :  { %v533_v38 = vpop.f32.mrf.mxu1 }
 0x1e0   :  { %vm308_vm2 = vcmp.ge.f32.partialorder %v303_v37, 0.0  ;;  %v309_v39 = vmul.f32 0.01, %v303_v37 }
 0x1e1   :  { %v305_v40 = vpop.f32.mrf.mxu1 }
 0x1e2   :  { %v310_v41 = vsel %vm308_vm2, %v303_v37, %v309_v39 }
 0x1e3   :  { %v311_v42 = vpack.c.bf16 %v310_v41, %v310_v41  ;;  %v534_v43 = vpop.f32.mrf.mxu1 }
 0x1e5   :  { %552 = vmatmul.mubr.bf16.vlgmr.msra.gmra.mxu0 %v311_v42 }
 0x2a5   :  { %v417_v45 = vpop.f32.mrf.mxu0 }
 0x2a6   :  { %v418_v46 = vadd.f32 %v459_v44, %v417_v45 }
 0x2a7   :  { %v553_v47 = vpop.f32.mrf.mxu0 }
 0x2a8   :  { %423 = vst [vmem:[#allocation10] sm:$0xff] %v418_v46 }
 0x2a9   :  { %v420_v48 = vpop.f32.mrf.mxu0 }
 0x2aa   :  { %679 = shalt.err (!%p676_p10)
}
 0x2ab   :  { %433 = dma.vmem_to_hbm [thread:$0]  %s431_s25, 128, %s815_s7, [#allocation4]   ;;  %v554_v49 = vpop.f32.mrf.mxu0 }
 0x2ac   :  { %694 = dma.done.wait [#allocation4], 128  }
 0x2ad   :  { %695 = vsyncadd [#allocation4], 4294967168 }
 0x2ae   :  { %437 = vsyncpa [#allocation3], 1 }
 0x2af   :  { %438 = vsyncpa [#allocation6], 1 }
 0x2b0   :  { %439 = vsyncpa [#allocation9], 1 }
 0x2b1   :  { %440 = vsyncpa [#allocation4], 1 }

// kernel: tpu_custom_call.1
= control target key start
LH: loop header
LB: loop body
LE: loop exit
PB: predicated region body
PF: predicated region fallthrough
CT: control target
= control target key end

     0   :  { %12 = vsyncpa [#allocation3], 0  ;;  %s808_s0 = inlined_call_operand.hbm [shape: bf16[8,128], index: 0, kind: input, shape index: {}]   ;;  %s809_s1 = inlined_call_operand.hbm [shape: bf16[128,128], index: 1, kind: input, shape index: {}]   ;;  %s810_s2 = inlined_call_operand.vmem [shape: f32[1,128], index: 2, kind: input, shape index: {}]   ;;  %s811_s3 = inlined_call_operand.hbm [shape: bf16[128,128], index: 3, kind: input, shape index: {}]   ;;  %s812_s4 = inlined_call_operand.vmem [shape: f32[1,128], index: 4, kind: input, shape index: {}]   ;;  %s813_s5 = inlined_call_operand.hbm [shape: bf16[128,128], index: 5, kind: input, shape index: {}]   ;;  %s814_s6 = inlined_call_operand.vmem [shape: f32[1,128], index: 6, kind: input, shape index: {}]   ;;  %s815_s7 = inlined_call_operand.hbm [shape: f32[8,128], index: 7, kind: output, shape index: {}]  }
   0x1   :  { %13 = vsyncpa [#allocation6], 0 }
   0x2   :  { %14 = vsyncpa [#allocation9], 0 }
   0x3   :  { %15 = vsyncpa [#allocation4], 0  ;;  %s696_s24 = smov [#allocation5]  }
   0x4   :  { %s31_s25 = sshll.u32 %s696_s24, 4  ;;  %s32_s25 = int_to_ptr.vmem [resolvable:$true] %s31_s25 }
   0x5   :  { %s596_s26 = scalar_lea.vmem %s32_s25, 1024  ;;  %p601_p1 = scmp.lt.s32.totalorder %s32_s25, %s32_s25 }
   0x6   :  { %p597_p0 = scmp.ne.s32.totalorder %s32_s25, %s596_s26  ;;  %p602_p2 = scmp.lt.s32.totalorder %s596_s26, %s596_s26 }
   0x8   :  { %p603_p3 = por %p602_p2, %p601_p1 }
   0xa   :  { %p604_p4 = pnand %p603_p3, %p597_p0 }
   0xc   :  { %607 = shalt.err (!%p604_p4)
}
   0xd   :  { %s697_s27 = smov 64   ;;  %s698_s28 = smov 4  }
   0xe   :  { %37 = dma.hbm_to_vmem [thread:$0]  %s809_s1, 1024, %s32_s25, [#allocation6], %s697_s27, %s697_s27, %s698_s28  }
   0xf   :  { %s699_s8 = smov [#allocation2]   ;;  %s700_s10 = smov [#allocation7]  }
  0x10   :  { %s22_s9 = sshll.u32 %s699_s8, 4  ;;  %s45_s11 = sshll.u32 %s700_s10, 4  ;;  %s23_s9 = int_to_ptr.vmem [resolvable:$true] %s22_s9  ;;  %s46_s11 = int_to_ptr.vmem [resolvable:$true] %s45_s11 }
  0x11   :  { %s616_s12 = scalar_lea.vmem %s23_s9, 64  ;;  %p621_p6 = scmp.lt.s32.totalorder %s23_s9, %s23_s9 }
  0x12   :  { %p617_p5 = scmp.ne.s32.totalorder %s23_s9, %s616_s12  ;;  %p622_p7 = scmp.lt.s32.totalorder %s616_s12, %s616_s12 }
  0x14   :  { %p623_p8 = por %p622_p7, %p621_p6 }
  0x16   :  { %p624_p9 = pnand %p623_p8, %p617_p5 }
  0x18   :  { %627 = shalt.err (!%p624_p9)
}
  0x19   :  { %25 = dma.hbm_to_vmem [thread:$0]  %s808_s0, 64, %s23_s9, [#allocation3]  }
  0x1a   :  { %s636_s15 = scalar_lea.vmem %s46_s11, 1024  ;;  %p641_p11 = scmp.lt.s32.totalorder %s46_s11, %s46_s11 }
  0x1b   :  { %p637_p10 = scmp.ne.s32.totalorder %s46_s11, %s636_s15  ;;  %p642_p12 = scmp.lt.s32.totalorder %s636_s15, %s636_s15 }
  0x1d   :  { %p643_p13 = por %p642_p12, %p641_p11 }
  0x1f   :  { %p644_p0 = pnand %p643_p13, %p637_p10 }
  0x21   :  { %647 = shalt.err (!%p644_p0)
}
  0x22   :  { %51 = dma.hbm_to_vmem [thread:$0]  %s811_s3, 1024, %s46_s11, [#allocation6], %s697_s27, %s697_s27, %s698_s28  }
  0x23   :  { %s701_s17 = smov [#allocation8]  }
  0x24   :  { %s59_s18 = sshll.u32 %s701_s17, 4  ;;  %s60_s18 = int_to_ptr.vmem [resolvable:$true] %s59_s18 }
  0x25   :  { %s656_s19 = scalar_lea.vmem %s60_s18, 1024  ;;  %p661_p2 = scmp.lt.s32.totalorder %s60_s18, %s60_s18 }
  0x26   :  { %p657_p1 = scmp.ne.s32.totalorder %s60_s18, %s656_s19  ;;  %p662_p3 = scmp.lt.s32.totalorder %s656_s19, %s656_s19 }
  0x28   :  { %p663_p4 = por %p662_p3, %p661_p2 }
  0x2a   :  { %p664_p5 = pnand %p663_p4, %p657_p1 }
  0x2c   :  { %667 = shalt.err (!%p664_p5)
}
  0x2d   :  { %65 = dma.hbm_to_vmem [thread:$0]  %s813_s5, 1024, %s60_s18, [#allocation9], %s697_s27, %s697_s27, %s698_s28  }
  0x2e   :  { %688 = dma.done.wait [#allocation3], 64  }
  0x2f   :  { %689 = vsyncadd [#allocation3], 4294967232 }
  0x30   :  { %690 = dma.done.wait [#allocation6], 2048  }
  0x31   :  { %691 = vsyncadd [#allocation6], 4294965248 }
  0x32   :  { %692 = dma.done.wait [#allocation9], 1024  }
  0x33   :  { %693 = vsyncadd [#allocation9], 4294966272  ;;  %v702_v0 = vmov 0.0   ;;  %vm703_vm0 = vmmov 0   ;;  %v564_v1 = vld [vmem:[#allocation5 + $0x38] sm:$0xff]   ;;  %v565_v2 = vld [vmem:[#allocation5 + $0x30] sm:$0xff]  }
  0x34   :  { %495 = vmatprep.subr.bf16.mxu0 %v702_v0  ;;  %511 = vmatprep.mubr.msk.bf16.mxu0 %vm703_vm0, %v702_v0  ;;  %v566_v3 = vld [vmem:[#allocation5 + $0x28] sm:$0xff]   ;;  %v572_v4 = vld [vmem:[#allocation7 + $0x38] sm:$0xff]   ;;  %v567_v5 = vld [vmem:[#allocation5 + $0x20] sm:$0xff]   ;;  %s704_s24 = smov [#allocation10]  }
  0x35   :  { %515 = vmatprep.subr.bf16.mxu1 %v702_v0  ;;  %531 = vmatprep.mubr.msk.bf16.mxu1 %vm703_vm0, %v702_v0  ;;  %v573_v6 = vld [vmem:[#allocation7 + $0x30] sm:$0xff]   ;;  %v568_v7 = vld [vmem:[#allocation5 + $0x18] sm:$0xff]   ;;  %v574_v8 = vld [vmem:[#allocation7 + $0x28] sm:$0xff]   ;;  %s430_s25 = sshll.u32 %s704_s24, 4  ;;  %s431_s25 = int_to_ptr.vmem [resolvable:$true] %s430_s25 }
  0x36   :  { %496 = vmatpush3.bf16.msra.mxu0 %v564_v1  ;;  %516 = vmatpush3.bf16.msra.mxu1 %v572_v4  ;;  %v569_v9 = vld [vmem:[#allocation5 + $0x10] sm:$0xff]   ;;  %v575_v10 = vld [vmem:[#allocation7 + $0x20] sm:$0xff]   ;;  %v570_v11 = vld [vmem:[#allocation5 + $0x8] sm:$0xff]   ;;  %p673_p7 = scmp.lt.s32.totalorder %s431_s25, %s431_s25 }
  0x37   :  { %497 = vmatprep.subr.bf16.mxu0 %v702_v0  ;;  %517 = vmatprep.subr.bf16.mxu1 %v702_v0  ;;  %v576_v12 = vld [vmem:[#allocation7 + $0x18] sm:$0xff]   ;;  %v571_v13 = vld [vmem:[#allocation5] sm:$0xff]   ;;  %v577_v14 = vld [vmem:[#allocation7 + $0x10] sm:$0xff]  }
  0x38   :  { %v81_v15 = vld [vmem:[#allocation2] sm:$0xf]  ;;  %v578_v16 = vld [vmem:[#allocation7 + $0x8] sm:$0xff]   ;;  %v579_v17 = vld [vmem:[#allocation7] sm:$0xff]  }
  0x39   :  { %v580_v18 = vld [vmem:[#allocation8 + $0x38] sm:$0xff]   ;;  %v581_v19 = vld [vmem:[#allocation8 + $0x30] sm:$0xff]   ;;  %v582_v20 = vld [vmem:[#allocation8 + $0x28] sm:$0xff]  }
  0x3a   :  { %498 = vmatpush3.bf16.msra.mxu0 %v565_v2  ;;  %518 = vmatpush3.bf16.msra.mxu1 %v573_v6  ;;  %v583_v21 = vld [vmem:[#allocation8 + $0x20] sm:$0xff]   ;;  %v584_v22 = vld [vmem:[#allocation8 + $0x18] sm:$0xff]   ;;  %v585_v23 = vld [vmem:[#allocation8 + $0x10] sm:$0xff]  }
  0x3b   :  { %499 = vmatprep.subr.bf16.mxu0 %v702_v0  ;;  %519 = vmatprep.subr.bf16.mxu1 %v702_v0  ;;  %v441_v24 = vld [vmem:[%s810_s2] ss:$0 sm:$0xff]  ;;  %v586_v33 = vld [vmem:[#allocation8 + $0x8] sm:$0xff]   ;;  %v587_v34 = vld [vmem:[#allocation8] sm:$0xff]  }
  0x3c   :  { %v450_v35 = vld [vmem:[%s812_s4] ss:$0 sm:$0xff]  ;;  %s668_s4 = scalar_lea.vmem %s431_s25, 128 }
  0x3d   :  { %v459_v44 = vld [vmem:[%s814_s6] ss:$0 sm:$0xff]  ;;  %p669_p6 = scmp.ne.s32.totalorder %s431_s25, %s668_s4  ;;  %p674_p8 = scmp.lt.s32.totalorder %s668_s4, %s668_s4 }
  0x3e   :  { %500 = vmatpush3.bf16.msra.mxu0 %v566_v3  ;;  %520 = vmatpush3.bf16.msra.mxu1 %v574_v8 }
  0x3f   :  { %501 = vmatprep.subr.bf16.mxu0 %v702_v0  ;;  %521 = vmatprep.subr.bf16.mxu1 %v702_v0  ;;  %p675_p9 = por %p674_p8, %p673_p7 }
  0x41   :  { %p676_p10 = pnand %p675_p9, %p669_p6 }
  0x42   :  { %502 = vmatpush3.bf16.msra.mxu0 %v567_v5  ;;  %522 = vmatpush3.bf16.msra.mxu1 %v575_v10 }
  0x43   :  { %503 = vmatprep.subr.bf16.mxu0 %v702_v0  ;;  %523 = vmatprep.subr.bf16.mxu1 %v702_v0 }
  0x46   :  { %504 = vmatpush3.bf16.msra.mxu0 %v568_v7  ;;  %524 = vmatpush3.bf16.msra.mxu1 %v576_v12 }
  0x47   :  { %505 = vmatprep.subr.bf16.mxu0 %v702_v0  ;;  %525 = vmatprep.subr.bf16.mxu1 %v702_v0 }
  0x4a   :  { %506 = vmatpush3.bf16.msra.mxu0 %v569_v9  ;;  %526 = vmatpush3.bf16.msra.mxu1 %v577_v14 }
  0x4b   :  { %507 = vmatprep.subr.bf16.mxu0 %v702_v0  ;;  %527 = vmatprep.subr.bf16.mxu1 %v702_v0 }
  0x4e   :  { %508 = vmatpush3.bf16.msra.mxu0 %v570_v11  ;;  %528 = vmatpush3.bf16.msra.mxu1 %v578_v16 }
  0x4f   :  { %509 = vmatprep.subr.bf16.mxu0 %v702_v0  ;;  %529 = vmatprep.subr.bf16.mxu1 %v702_v0 }
  0x52   :  { %510 = vmatpush3.bf16.msra.mxu0 %v571_v13  ;;  %530 = vmatpush3.bf16.msra.mxu1 %v579_v17 }
  0x53   :  { %535 = vmatprep.subr.bf16.mxu0 %v702_v0 }
  0x55   :  { %512 = vmatmul.mubr.bf16.vlgmr.msra.gmra.mxu0 %v81_v15 }
  0x56   :  { %551 = vmatprep.mubr.msk.bf16.mxu0 %vm703_vm0, %v702_v0  ;;  %536 = vmatpush3.bf16.msra.mxu0 %v580_v18 }
  0x57   :  { %537 = vmatprep.subr.bf16.mxu0 %v702_v0 }
  0x5a   :  { %538 = vmatpush3.bf16.msra.mxu0 %v581_v19 }
  0x5b   :  { %539 = vmatprep.subr.bf16.mxu0 %v702_v0 }
  0x5e   :  { %540 = vmatpush3.bf16.msra.mxu0 %v582_v20 }
  0x5f   :  { %541 = vmatprep.subr.bf16.mxu0 %v702_v0 }
  0x62   :  { %542 = vmatpush3.bf16.msra.mxu0 %v583_v21 }
  0x63   :  { %543 = vmatprep.subr.bf16.mxu0 %v702_v0 }
  0x66   :  { %544 = vmatpush3.bf16.msra.mxu0 %v584_v22 }
  0x67   :  { %545 = vmatprep.subr.bf16.mxu0 %v702_v0 }
  0x6a   :  { %546 = vmatpush3.bf16.msra.mxu0 %v585_v23 }
  0x6b   :  { %547 = vmatprep.subr.bf16.mxu0 %v702_v0 }
  0x6e   :  { %548 = vmatpush3.bf16.msra.mxu0 %v586_v33 }
  0x6f   :  { %549 = vmatprep.subr.bf16.mxu0 %v702_v0 }
  0x72   :  { %550 = vmatpush3.bf16.msra.mxu0 %v587_v34 }
 0x115   :  { %v187_v25 = vpop.f32.mrf.mxu0 }
 0x116   :  { %v188_v26 = vadd.f32 %v441_v24, %v187_v25 }
 0x117   :  { %v513_v27 = vpop.f32.mrf.mxu0 }
 0x118   :  { %vm193_vm1 = vcmp.ge.f32.partialorder %v188_v26, 0.0  ;;  %v194_v28 = vmul.f32 0.01, %v188_v26 }
 0x119   :  { %v190_v29 = vpop.f32.mrf.mxu0 }
 0x11a   :  { %v195_v30 = vsel %vm193_vm1, %v188_v26, %v194_v28 }
 0x11b   :  { %v514_v31 = vpop.f32.mrf.mxu0  ;;  %v196_v32 = vpack.c.bf16 %v195_v30, %v195_v30 }
 0x11d   :  { %532 = vmatmul.mubr.bf16.vlgmr.msra.gmra.mxu1 %v196_v32 }
 0x1dd   :  { %v302_v36 = vpop.f32.mrf.mxu1 }
 0x1de   :  { %v303_v37 = vadd.f32 %v450_v35, %v302_v36 }
 0x1df   :  { %v533_v38 = vpop.f32.mrf.mxu1 }
 0x1e0   :  { %vm308_vm2 = vcmp.ge.f32.partialorder %v303_v37, 0.0  ;;  %v309_v39 = vmul.f32 0.01, %v303_v37 }
 0x1e1   :  { %v305_v40 = vpop.f32.mrf.mxu1 }
 0x1e2   :  { %v310_v41 = vsel %vm308_vm2, %v303_v37, %v309_v39 }
 0x1e3   :  { %v311_v42 = vpack.c.bf16 %v310_v41, %v310_v41  ;;  %v534_v43 = vpop.f32.mrf.mxu1 }
 0x1e5   :  { %552 = vmatmul.mubr.bf16.vlgmr.msra.gmra.mxu0 %v311_v42 }
 0x2a5   :  { %v417_v45 = vpop.f32.mrf.mxu0 }
 0x2a6   :  { %v418_v46 = vadd.f32 %v459_v44, %v417_v45 }
 0x2a7   :  { %v553_v47 = vpop.f32.mrf.mxu0 }
 0x2a8   :  { %423 = vst [vmem:[#allocation10] sm:$0xff] %v418_v46 }
 0x2a9   :  { %v420_v48 = vpop.f32.mrf.mxu0 }
 0x2aa   :  { %679 = shalt.err (!%p676_p10)
}
 0x2ab   :  { %433 = dma.vmem_to_hbm [thread:$0]  %s431_s25, 128, %s815_s7, [#allocation4]   ;;  %v554_v49 = vpop.f32.mrf.mxu0 }
 0x2ac   :  { %694 = dma.done.wait [#allocation4], 128  }
 0x2ad   :  { %695 = vsyncadd [#allocation4], 4294967168 }
 0x2ae   :  { %437 = vsyncpa [#allocation3], 1 }
 0x2af   :  { %438 = vsyncpa [#allocation6], 1 }
 0x2b0   :  { %439 = vsyncpa [#allocation9], 1 }
 0x2b1   :  { %440 = vsyncpa [#allocation4], 1 }

</bundles_post_ra>
